<compile_context>
chip_gen: v6e
topology: v6e:2x2x1
jax: 0.10.0
libtpu: 0.0.40
codegen_flags: <defaults>
</compile_context>

<pallas_src>
import numpy as np
import jax
import jax.numpy as jnp
from jax.experimental import pallas as pl
from jax.experimental.pallas import tpu as pltpu


def _rup(x, m):
    return ((x + m - 1) // m) * m


def _divisors_desc(n):
    ds = {d for i in range(1, int(n ** 0.5) + 1) if n % i == 0 for d in (i, n // i)}
    return sorted(ds, reverse=True)


def _vmem_block_budget():
    """~1/8 of physical VMEM: ~16 MiB on v5e/v6e (128 MiB), ~8 MiB on v7x (64 MiB)."""
    cap = 128 * 2 ** 20
    try:
        info = pltpu.get_tpu_info()
        cap = int(getattr(info, "vmem_capacity_bytes", cap))
    except Exception:
        pass
    return max(2 * 2 ** 20, cap // 8)


def _additive_attention_kernel(sd_ref, bias_ref, m_ref, ctx_ref, attn_ref):
    # additive score: decoder-side scalar (bt, Lp, 1) + encoder-side row (bt, 1, Ep)
    w = sd_ref[...] + bias_ref[...]                          # (bt, Lp, Ep), VPU add

    # masked softmax over the (padded) encoder axis; padded/masked cols carry -inf
    m = jnp.max(w, axis=-1, keepdims=True)
    p = jnp.exp(w - m)
    denom = jnp.sum(p, axis=-1, keepdims=True)
    attn = p * pl.reciprocal(denom, approx=True)             # EUP vrcp (free slot)
    attn_ref[...] = attn.astype(attn_ref.dtype)

    # context = attn @ M  (per-batch MXU matmul; M encodes torch's repeat/reshape)
    ctx = jnp.einsum('ble,bed->bld', attn.astype(m_ref.dtype), m_ref[...],
                     preferred_element_type=jnp.float32)     # (bt, Lp, tf)
    ctx_ref[...] = ctx.astype(ctx_ref.dtype)


def additive_attention(decoder_states, decoder_mask, encoder_states, encoder_mask,
                       params):
    # decoder_mask accepted for API parity with the PyTorch module (unused there too).
    del decoder_mask
    w_enc, w_dec, w_w, b_w = params
    B, L, D = decoder_states.shape
    _, E, F = encoder_states.shape          # F == 2 * d_model
    assert F == 2 * D
    out_dtype = decoder_states.dtype
    out_isz = jnp.dtype(out_dtype).itemsize

    f32 = jnp.float32
    dec = decoder_states.astype(f32)
    enc = encoder_states.astype(f32)
    w_enc = jnp.asarray(w_enc, f32)         # (D, 2D)  nn.Linear(out,in) layout
    w_dec = jnp.asarray(w_dec, f32)         # (D, D)
    w_w = jnp.asarray(w_w, f32)             # (1, D)
    b_w = jnp.asarray(b_w, f32)             # (1,)

    # ---- fold weight_projection into both projections (mathematically identical):
    #   score[b,i,j] = w . (W_dec dec_i + W_enc enc_j) + b = dec_i.v_dec + enc_j.v_enc + b
    wv = w_w.reshape(D)
    v_dec = w_dec.T @ wv                    # (D,)
    v_enc = w_enc.T @ wv                    # (2D,)

    # tiny XLA precomputes (fuse with each other; remove in-kernel reduce + DMA stream)
    sd = jnp.einsum('bld,d->bl', dec, v_dec)                     # (B, L)
    log_mask = jnp.log(encoder_mask.astype(f32))                 # -inf where masked
    enc_bias = enc @ v_enc + b_w[0] + log_mask                   # (B, E)
    # NOTE: a fully-masked encoder row yields NaN attention, same as the torch module.

    # ---- padded geometry: lane dims -> 128, sublane dim dtype-aware ----
    sub = max(8, 32 // out_isz)             # f32 -> 8, bf16 -> 16, int8 -> 32
    Lp, Ep, Fp = _rup(L, sub), _rup(E, 128), _rup(F, 128)

    # ---- block-size selection (generation-aware VMEM budget) ----
    budget = _vmem_block_budget()

    def blk_bytes(bt, tf):
        return bt * (Lp * 4 + Ep * 4 + Ep * tf * 2            # sd, bias, M(bf16)
                     + Lp * tf * out_isz + Lp * Ep * out_isz)  # ctx, attn

    nfu = Fp // 128
    tf = 128
    for d in _divisors_desc(nfu):           # largest feature tile that fits budget
        if blk_bytes(1, d * 128) <= budget:
            tf = d * 128
            break
    nF = Fp // tf
    bt = int(max(1, min(B, budget // max(1, blk_bytes(1, tf)))))
    # keep >=2 grid steps so v7x megacore sharding / pipeline overlap have work
    if bt > 1 and (-(-B // bt)) * nF < 2:
        bt = (B + 1) // 2
    grid_b = -(-B // bt)
    Bp = grid_b * bt
    # TODO(synk): add an Ep (softmax/reduction) tiling axis for very large encoders.

    # ---- build operands directly at padded shapes (no jnp.pad second HBM copy) ----
    sd_p = jnp.zeros((Bp, Lp, 1), f32).at[:B, :L, 0].set(sd)
    bias_p = jnp.full((Bp, 1, Ep), -jnp.inf, f32).at[:B, 0, :E].set(enc_bias)

    # Per-batch gather matrix reproducing torch's attn.repeat(1,1,2D).reshape(...):
    #   context[b,i,d] = sum_j enc[b,j,d] * attn[b,i,(j*F+d)%E] = (attn @ M)[b,i,d]
    jj = jnp.arange(E)[:, None]
    dd = jnp.arange(F)[None, :]
    idx = (jj * F + dd) % E                                       # (E, F)
    M_p = (jnp.zeros((Bp, Ep, Fp), f32).at[:B, idx, dd].add(enc)  # f32 scatter-add
           .astype(jnp.bfloat16))                                 # halve DMA bytes

    blk = blk_bytes(bt, tf)
    vmem_limit = int(min(48 * 2 ** 20, max(8 * 2 ** 20, 3 * blk + (2 << 20))))

    grid_spec = pltpu.PrefetchScalarGridSpec(
        num_scalar_prefetch=0,
        grid=(grid_b, nF),
        in_specs=[
            pl.BlockSpec((bt, Lp, 1), lambda b, f: (b, 0, 0)),    # decoder-side score
            pl.BlockSpec((bt, 1, Ep), lambda b, f: (b, 0, 0)),    # enc score + bias + mask
            pl.BlockSpec((bt, Ep, tf), lambda b, f: (b, 0, f)),   # gather matrix M (bf16)
        ],
        out_specs=[
            pl.BlockSpec((bt, Lp, tf), lambda b, f: (b, 0, f)),   # context (padded)
            pl.BlockSpec((bt, Lp, Ep), lambda b, f: (b, 0, 0)),   # attention (resident over f)
        ],
    )

    ctx_p, attn_p = pl.pallas_call(
        _additive_attention_kernel,
        out_shape=(jax.ShapeDtypeStruct((Bp, Lp, Fp), out_dtype),
                   jax.ShapeDtypeStruct((Bp, Lp, Ep), out_dtype)),
        grid_spec=grid_spec,
        compiler_params=pltpu.CompilerParams(
            dimension_semantics=("parallel", "arbitrary"),
            vmem_limit_bytes=vmem_limit),
    )(sd_p, bias_p, M_p)

    return ctx_p[:B, :L, :F], attn_p[:B, :L, :E]


def reference_forward(dec, dec_mask, enc, enc_mask, params):
    """Plain-JAX transcription of the exact PyTorch forward (for validation)."""
    del dec_mask
    w_enc, w_dec, w_w, b_w = params
    B, L, D = dec.shape
    _, E, twoD = enc.shape
    pe = enc @ w_enc.T                                            # (B, E, D)
    pd = dec @ w_dec.T                                            # (B, L, D)
    pe_r = jnp.tile(pe, (1, L, 1)).reshape(B, L, E, D)
    pd_r = jnp.tile(pd, (1, 1, E)).reshape(B, L, E, D)
    weights = ((pe_r + pd_r) @ w_w.T + b_w).reshape(B, L, E)
    log_mask = jnp.log(jnp.tile(enc_mask[:, None, :], (1, L, 1)).astype(jnp.float32))
    attn = jax.nn.softmax(weights + log_mask, axis=2)
    enc_r = jnp.tile(enc, (1, L, 1)).reshape(B, L, E, twoD)
    attn_r = jnp.tile(attn, (1, 1, twoD)).reshape(B, L, E, twoD)  # torch repeat semantics
    context = (enc_r * attn_r).sum(axis=2)
    return context, attn


if __name__ == "__main__":
    B, L, E, D = 2, 8, 8, 32
    twoD = 2 * D

    key = jax.random.PRNGKey(0)
    k1, k2, k3, k4, k5, k6 = jax.random.split(key, 6)
    decoder_states = jax.random.normal(k1, (B, L, D), jnp.float32)
    encoder_states = jax.random.normal(k2, (B, E, twoD), jnp.float32)
    decoder_mask = jnp.ones((B, L), jnp.float32)
    encoder_mask = jnp.ones((B, E), jnp.float32).at[1, E - 2:].set(0.0)

    # deterministic parameter init, shapes match nn.Linear(out, in) weights
    w_enc = 0.1 * jax.random.normal(k3, (D, twoD), jnp.float32)   # encoder_projection.weight
    w_dec = 0.1 * jax.random.normal(k4, (D, D), jnp.float32)      # decoder_projection.weight
    w_w = 0.1 * jax.random.normal(k5, (1, D), jnp.float32)        # weight_projection.weight
    b_w = 0.1 * jax.random.normal(k6, (1,), jnp.float32)          # weight_projection.bias
    params = (w_enc, w_dec, w_w, b_w)

    context, attn = additive_attention(decoder_states, decoder_mask,
                                       encoder_states, encoder_mask, params)
    jax.block_until_ready((context, attn))

    ref_ctx, ref_attn = reference_forward(decoder_states, decoder_mask,
                                          encoder_states, encoder_mask, params)
    assert context.shape == (B, L, twoD) and attn.shape == (B, L, E)
    # attn: exact math except approx EUP reciprocal; context: bf16 M / bf16 attn operand
    assert np.allclose(np.asarray(attn), np.asarray(ref_attn), atol=2e-3, rtol=2e-3)
    assert np.allclose(np.asarray(context), np.asarray(ref_ctx), atol=2e-2, rtol=2e-2)
    print("KERNEL_OK")
</pallas_src>

<mosaic_0001>
module attributes {stable_mosaic.version = 11 : i64} {
  func.func @_additive_attention_kernel(%arg0: i32, %arg1: i32, %arg2: memref<1x8x1xf32, #tpu.memory_space<vmem>>, %arg3: memref<1x1x128xf32, #tpu.memory_space<vmem>>, %arg4: memref<1x128x128xbf16, #tpu.memory_space<vmem>>, %arg5: memref<1x8x128xf32, #tpu.memory_space<vmem>>, %arg6: memref<1x8x128xf32, #tpu.memory_space<vmem>>) attributes {dimension_semantics = [#tpu.dimension_semantics<parallel>, #tpu.dimension_semantics<arbitrary>], iteration_bounds = array<i64: 2, 1>, scalar_prefetch = 0 : i64, scratch_operands = 0 : i64, tpu.core_type = #tpu.core_type<tc>, window_params = [{transform_indices = @transform_0, window_bounds = array<i64: 1, 8, 1>}, {transform_indices = @transform_1, window_bounds = array<i64: 1, 1, 128>}, {transform_indices = @transform_2, window_bounds = array<i64: 1, 128, 128>}, {transform_indices = @transform_3, window_bounds = array<i64: 1, 8, 128>}, {transform_indices = @transform_4, window_bounds = array<i64: 1, 8, 128>}]} {
    %c0 = arith.constant 0 : index
    %c0_0 = arith.constant 0 : index
    %c0_1 = arith.constant 0 : index
    %0 = vector.load %arg2[%c0, %c0_0, %c0_1] : memref<1x8x1xf32, #tpu.memory_space<vmem>>, vector<1x8x1xf32>
    %c0_2 = arith.constant 0 : index
    %c0_3 = arith.constant 0 : index
    %c0_4 = arith.constant 0 : index
    %1 = vector.load %arg3[%c0_2, %c0_3, %c0_4] : memref<1x1x128xf32, #tpu.memory_space<vmem>>, vector<1x1x128xf32>
    %2 = vector.broadcast %0 : vector<1x8x1xf32> to vector<1x8x128xf32>
    %3 = vector.broadcast %1 : vector<1x1x128xf32> to vector<1x8x128xf32>
    %4 = arith.addf %2, %3 : vector<1x8x128xf32>
    %cst = arith.constant dense<0xFF800000> : vector<1x8xf32>
    %5 = vector.multi_reduction <maximumf>, %4, %cst [2] : vector<1x8x128xf32> to vector<1x8xf32>
    %6 = vector.shape_cast %5 : vector<1x8xf32> to vector<1x8x1xf32>
    %7 = vector.broadcast %6 : vector<1x8x1xf32> to vector<1x8x128xf32>
    %8 = arith.subf %4, %7 : vector<1x8x128xf32>
    %9 = math.exp %8 : vector<1x8x128xf32>
    %cst_5 = arith.constant dense<0.000000e+00> : vector<1x8xf32>
    %10 = vector.multi_reduction <add>, %9, %cst_5 [2] : vector<1x8x128xf32> to vector<1x8xf32>
    %11 = vector.shape_cast %10 : vector<1x8xf32> to vector<1x8x1xf32>
    %12 = tpu.reciprocal %11 {approx = true} : vector<1x8x1xf32> -> vector<1x8x1xf32>
    %13 = vector.broadcast %12 : vector<1x8x1xf32> to vector<1x8x128xf32>
    %14 = arith.mulf %9, %13 : vector<1x8x128xf32>
    %c0_6 = arith.constant 0 : index
    %c0_7 = arith.constant 0 : index
    %c0_8 = arith.constant 0 : index
    %15 = vector.load %arg6[%c0_6, %c0_7, %c0_8] : memref<1x8x128xf32, #tpu.memory_space<vmem>>, vector<1x8x128xf32>
    tpu.vector_store %arg6[%c0_6, %c0_7, %c0_8], %14 {strides = array<i32>} : memref<1x8x128xf32, #tpu.memory_space<vmem>>, vector<1x8x128xf32>,
    %16 = arith.truncf %14 : vector<1x8x128xf32> to vector<1x8x128xbf16>
    %c0_9 = arith.constant 0 : index
    %c0_10 = arith.constant 0 : index
    %c0_11 = arith.constant 0 : index
    %17 = vector.load %arg4[%c0_9, %c0_10, %c0_11] : memref<1x128x128xbf16, #tpu.memory_space<vmem>>, vector<1x128x128xbf16>
    "tpu.trace_start"() <{level = 10 : i32, message = "ble,bed->bld"}> : () -> ()
    %cst_12 = arith.constant dense<0.000000e+00> : vector<1x8x128xf32>
    %18 = tpu.matmul %16, %17, %cst_12 {dimension_numbers = #tpu.dot_dimension_numbers<[2], [1], [1], [2], [0, 0, 0, 1, 1, 2], [0], [0]>} : vector<1x8x128xbf16>, vector<1x128x128xbf16>, vector<1x8x128xf32> -> vector<1x8x128xf32>
    "tpu.trace_stop"() : () -> ()
    %c0_13 = arith.constant 0 : index
    %c0_14 = arith.constant 0 : index
    %c0_15 = arith.constant 0 : index
    %19 = vector.load %arg5[%c0_13, %c0_14, %c0_15] : memref<1x8x128xf32, #tpu.memory_space<vmem>>, vector<1x8x128xf32>
    tpu.vector_store %arg5[%c0_13, %c0_14, %c0_15], %18 {strides = array<i32>} : memref<1x8x128xf32, #tpu.memory_space<vmem>>, vector<1x8x128xf32>,
    return
  }
  func.func @transform_0(%arg0: i32, %arg1: i32) -> (i32, i32, i32) {
    %c0_i32 = arith.constant 0 : i32
    %c0_i32_0 = arith.constant 0 : i32
    %c0_i32_1 = arith.constant 0 : i32
    return %arg0, %c0_i32, %c0_i32_0 : i32, i32, i32
  }
  func.func @transform_1(%arg0: i32, %arg1: i32) -> (i32, i32, i32) {
    %c0_i32 = arith.constant 0 : i32
    %c0_i32_0 = arith.constant 0 : i32
    %c0_i32_1 = arith.constant 0 : i32
    return %arg0, %c0_i32, %c0_i32_0 : i32, i32, i32
  }
  func.func @transform_2(%arg0: i32, %arg1: i32) -> (i32, i32, i32) {
    %c0_i32 = arith.constant 0 : i32
    %c0_i32_0 = arith.constant 0 : i32
    return %arg0, %c0_i32, %arg1 : i32, i32, i32
  }
  func.func @transform_3(%arg0: i32, %arg1: i32) -> (i32, i32, i32) {
    %c0_i32 = arith.constant 0 : i32
    %c0_i32_0 = arith.constant 0 : i32
    return %arg0, %c0_i32, %arg1 : i32, i32, i32
  }
  func.func @transform_4(%arg0: i32, %arg1: i32) -> (i32, i32, i32) {
    %c0_i32 = arith.constant 0 : i32
    %c0_i32_0 = arith.constant 0 : i32
    %c0_i32_1 = arith.constant 0 : i32
    return %arg0, %c0_i32, %c0_i32_0 : i32, i32, i32
  }
}

</mosaic_0001>

<bundles_post_ra>
// kernel: tpu_custom_call.1
= control target key start
LH: loop header
LB: loop body
LE: loop exit
PB: predicated region body
PF: predicated region fallthrough
CT: control target
= control target key end

     0   :  { %10 = vsyncpa [#allocation3], 0  ;;  %s1075_s0 = inlined_call_operand.vmem [shape: f32[2,8,1], index: 0, kind: input, shape index: {}]   ;;  %s1076_s1 = inlined_call_operand.vmem [shape: f32[2,1,128], index: 1, kind: input, shape index: {}]   ;;  %s1077_s2 = inlined_call_operand.hbm [shape: bf16[2,128,128], index: 2, kind: input, shape index: {}]   ;;  %s1078_s3 = inlined_call_operand.hbm [shape: f32[2,8,128], index: 3, kind: output, shape index: {0}]   ;;  %s1079_s4 = inlined_call_operand.hbm [shape: f32[2,8,128], index: 4, kind: output, shape index: {1}]  }
   0x1   :  { %12 = vsyncpa [#allocation3 + $0x1], 0 }
   0x2   :  { %13 = vsyncpa [#allocation4], 0 }
   0x3   :  { %15 = vsyncpa [#allocation4 + $0x1], 0 }
   0x4   :  { %16 = vsyncpa [#allocation7], 0 }
   0x5   :  { %18 = vsyncpa [#allocation7 + $0x1], 0  ;;  %s888_s15 = smov 0   ;;  %s890_s16 = smov 0  }
   0x6   :  { %s892_s17 = smov 0   ;;  %s894_s18 = smov 0  }
   0x7   :  { %s896_s19 = smov 0   ;;  %s898_s20 = smov 0  }
   0x8 LB: > { %s573_s21 = sadd.s32 4294967295, %s853_s20   ;;  %s574_s22 = sadd.s32 4294967294, %s853_s20   ;;  %s853_s20 = sphi %s898_s20, %s24_s20   ;;  %s849_s19 = sphi %s896_s19, %s1090_s19   ;;  %s845_s18 = sphi %s894_s18, %s1089_s18   ;;  %s841_s17 = sphi %s892_s17, %s1088_s17   ;;  %s837_s16 = sphi %s890_s16, %s1087_s16   ;;  %s833_s15 = sphi %s888_s15, %s1086_s15  }
   0x9   : > { %s36_s23 = sadd.s32 1, %s849_s19  ;;  %s97_s24 = sadd.s32 1, %s841_s17 }
   0xa   : > { %p38_p0 = scmp.ge.s32.totalorder %s36_s23, 2  ;;  %p104_p1 = scmp.ne.s32.totalorder %s841_s17, %s837_s16 }
   0xb   : > { %p105_p2 = scmp.eq.s32.totalorder %s853_s20, 0  ;;  %p110_p3 = scmp.ne.s32.totalorder %s837_s16, %s833_s15 }
   0xc   : > { %s1092_s23 = smov (%p38_p0, %s36_s23), 0  ;;  %p111_p5 = scmp.eq.s32.totalorder %s573_s21, 0 }
   0xd   : > { %p929_p4 = por %p105_p2, %p104_p1  ;;  %s92_s26 = ssub.s32 %s849_s19, %s1092_s23 }
   0xe   : > { %p136_p6 = scmp.eq.s32.totalorder %s573_s21, 1  ;;  %p95_p7 = scmp.eq.s32.totalorder %s92_s26, 0 }
   0xf   : > { %p935_p8 = por %p111_p5, %p110_p3  ;;  %p142_p10 = scmp.eq.s32.totalorder %s574_s22, 1 }
  0x10   : > { %p939_p9 = por %p136_p6, %p104_p1  ;;  %p647_p13 = scmp.lt.s32.totalorder %s853_s20, 2 }
  0x11   : > { %s944_s29 = scalar_select %p95_p7, %s841_s17, %s97_s24  }
  0x12   : > { %p946_p11 = por %p142_p10, %p110_p3  ;;  %s201_s5 = sand.u32 1, %s841_s17  }
  0x13   : > { %s577_s6 = sshll.u32 %s201_s5, 6  ;;  %s600_s7 = sshll.u32 %s849_s19, 10 }
  0x14   : > { %s212_s10 = scalar_lea.hbm %s1077_s2, %s600_s7  ;;  %s205_s11 = scalar_lea.vmem [#allocation2], %s577_s6 }
  0x15   : > { %s213_s12 = sshll.u32 %s205_s11, 4  ;;  %p959_p0 = pnand %p647_p13, %p929_p4  ;;  %s214_s12 = int_to_ptr.vmem [resolvable:$true] %s213_s12 }
  0x16   : > { %p580_p1 = scmp.ge.s32.totalorder %s853_s20, 1  ;;  %s202_s14 = scalar_lea.sflag [#allocation3], %s201_s5 }
  0x17   : > { %p717_p2 = pneg %p959_p0  ;;  %s728_s21 = scalar_lea.vmem %s214_s12, 1024 }
  0x18   : > { %p729_p3 = scmp.ne.s32.totalorder %s214_s12, %s728_s21  ;;  %s855_s22 = smov [#allocation2]  }
  0x19   : > { %s733_s24 = sshll.u32 %s855_s22, 4  ;;  %s734_s24 = int_to_ptr.vmem [resolvable:$false] %s733_s24 }
  0x1a   : > { %p731_p5 = pnand %p729_p3, %p717_p2  ;;  %s735_s26 = scalar_lea.vmem %s734_s24, 2048 }
  0x1b   : > { %p736_p7 = scmp.lt.s32.totalorder %s214_s12, %s734_s24  ;;  %p737_p10 = scmp.lt.s32.totalorder %s735_s26, %s728_s21 }
  0x1c   : > { %p732_p6 = pneg %p731_p5 }
  0x1d   : > { %p738_p12 = por %p737_p10, %p736_p7 }
  0x1f   : > { %p739_p4 = pnand %p738_p12, %p732_p6 }
  0x21   : > { %742 = shalt.err (!%p739_p4)
}
  0x22   : > { %s856_s25 = smov 64   ;;  %s857_s5 = smov 4  }
  0x23   : > { %639 = dma.hbm_to_vmem [thread:$0]  (!%p959_p0), %s212_s10, 1024, %s214_s12, %s202_s14, %s856_s25, %s856_s25, %s857_s5  }
  0x24   : > { %p221_p13 = scmp.lt.s32.totalorder %s853_s20, 3 }
  0x26   : > { %p222_p2 = pnand %p580_p1, %p221_p13 }
  0x27   : > { %s972_s6 = sand.u32 (!%p222_p2), 1, %s837_s16  }
  0x28   : > { %225 = sbr.rel (%p222_p2) target bundleno = 700 (0x2bc), region = 32  ;;  %s581_s7 = sshll.u32 (!%p222_p2), %s972_s6, 6 }
  0x29   : > { %s228_s8 = scalar_lea.sflag (!%p222_p2), [#allocation3], %s972_s6  ;;  %s976_s9 = scalar_lea.vmem (!%p222_p2), [#allocation2], %s581_s7 }
  0x2d   : > { %820 = dma.done.wait (%p935_p8), %s228_s8, 1024  }
  0x2e   : > { %822 = vsyncadd (%p935_p8), %s228_s8, 4294966272  ;;  %p268_p12 = scmp.lt.s32.totalorder %s845_s18, 1  ;;  %v858_v0 = vmov 0   ;;  %v703_v5 = vld [vmem:[%s976_s9 + $0x38] sm:$0xff]   ;;  %v859_v6 = vmov 0.0   ;;  %v704_v7 = vld [vmem:[%s976_s9 + $0x30] sm:$0xff]  }
  0x2f   : > { %702 = vset.pattern.permute.xlu0 %v858_v0  ;;  %610 = vmatprep.subr.bf16.mxu0 %v859_v6  ;;  %v705_v8 = vld [vmem:[%s976_s9 + $0x28] sm:$0xff]   ;;  %v706_v9 = vld [vmem:[%s976_s9 + $0x20] sm:$0xff]   ;;  %v707_v14 = vld [vmem:[%s976_s9 + $0x18] sm:$0xff]   ;;  %vm860_vm0 = vmmov 0   ;;  %s582_s24 = sshll.u32 %s972_s6, 3  ;;  %s596_s25 = sshll.u32 %s845_s18, 7 }
  0x30   : > { %s269_s10 = scalar_select %p268_p12, %s845_s18, 1  ;;  %611 = vmatpush3.bf16.msra.mxu0 %v703_v5  ;;  %626 = vmatprep.mubr.msk.bf16.mxu0 %vm860_vm0, %v859_v6  ;;  %v708_v15 = vld [vmem:[%s976_s9 + $0x10] sm:$0xff]   ;;  %v709_v16 = vld [vmem:[%s976_s9 + $0x8] sm:$0xff]   ;;  %v710_v17 = vld [vmem:[%s976_s9] sm:$0xff]  }
  0x31   : > { %612 = vmatprep.subr.bf16.mxu0 %v859_v6  ;;  %s267_s26 = scalar_lea.vmem [#allocation6], %s582_s24  ;;  %s437_s9 = scalar_lea.hbm %s1079_s4, %s596_s25 }
  0x32   : > { %s584_s11 = sshll.u32 %s269_s10, 3  ;;  %s274_s27 = scalar_lea.vmem %s1076_s1, %s269_s10 }
  0x33   : > { %s271_s14 = scalar_lea.vmem %s1075_s0, %s584_s11  ;;  %v585_v2 = vld [vmem:[%s274_s27] ss:$0 sm:$0xff]  ;;  %s439_s5 = sshll.u32 %s267_s26, 4  ;;  %s440_s5 = int_to_ptr.vmem [resolvable:$true] %s439_s5 }
  0x34   : > { %v276_v1 = vld [vmem:[%s271_s14] sm:$0xff]  ;;  %613 = vmatpush3.bf16.msra.mxu0 %v704_v7  ;;  %s412_s10 = scalar_lea.sflag [#allocation7], %s972_s6  ;;  %s743_s11 = scalar_lea.vmem %s440_s5, 128 }
  0x35   : > { %280 = vperm.xlu0 %702, %v276_v1   ;;  %614 = vmatprep.subr.bf16.mxu0 %v859_v6  ;;  %p744_p8 = scmp.ne.s32.totalorder %s440_s5, %s743_s11  ;;  %s861_s12 = smov [#allocation6]  }
  0x36   : > { %s747_s13 = sshll.u32 %s861_s12, 4  ;;  %s748_s13 = int_to_ptr.vmem [resolvable:$false] %s747_s13 }
  0x37   : > { %p745_p0 = pnand %p744_p8, %p939_p9  ;;  %s749_s14 = scalar_lea.vmem %s748_s13, 256 }
  0x38   : > { %615 = vmatpush3.bf16.msra.mxu0 %v705_v8  ;;  %p750_p3 = scmp.lt.s32.totalorder %s440_s5, %s748_s13  ;;  %p751_p5 = scmp.lt.s32.totalorder %s749_s14, %s743_s11 }
  0x39   : > { %616 = vmatprep.subr.bf16.mxu0 %v859_v6  ;;  %p746_p1 = pneg %p745_p0 }
  0x3a   : > { %p752_p6 = por %p751_p5, %p750_p3 }
  0x3c   : > { %617 = vmatpush3.bf16.msra.mxu0 %v706_v9  ;;  %p753_p7 = pnand %p752_p6, %p746_p1 }
  0x3d   : > { %618 = vmatprep.subr.bf16.mxu0 %v859_v6 }
  0x40   : > { %619 = vmatpush3.bf16.msra.mxu0 %v707_v14 }
  0x41   : > { %620 = vmatprep.subr.bf16.mxu0 %v859_v6 }
  0x44   : > { %621 = vmatpush3.bf16.msra.mxu0 %v708_v15 }
  0x45   : > { %622 = vmatprep.subr.bf16.mxu0 %v859_v6 }
  0x48   : > { %623 = vmatpush3.bf16.msra.mxu0 %v709_v16 }
  0x49   : > { %624 = vmatprep.subr.bf16.mxu0 %v859_v6 }
  0x4c   : > { %625 = vmatpush3.bf16.msra.mxu0 %v710_v17 }
  0xb0   : > { %v281_v3 = vpop.permute.xlu0 %280 }
  0xb1   : > { %v289_v4 = vadd.f32 %v585_v2, %v281_v3 }
  0xb3   : > { %290 = vmax.xlane.f32.xlu0 %v289_v4 }
 0x13c   : > { %v291_v10 = vpop.xlane.xlu0 %290 }
 0x13d   : > { %v292_v11 = vsub.f32 %v289_v4, %v291_v10 }
 0x13f   : > { %v293_v12 = vmul.f32 1.442695, %v292_v11 }
 0x141   : > { %711 = vpow2.f32 %v293_v12 }
 0x14e   : > { %v712_v13 = vpop.eup %711 }
 0x14f   : > { %295 = vadd.xlane.f32.xlu1 %v712_v13 }
 0x1d8   : > { %v296_v18 = vpop.xlane.xlu1 %295 }
 0x1d9   : > { %713 = vrcp.f32 %v296_v18 }
 0x1e6   : > { %v714_v19 = vpop.eup %713 }
 0x1e7   : > { %v298_v20 = vmul.f32 %v714_v19, %v712_v13 }
 0x1e9   : > { %v300_v21 = vpack.c.bf16 %v298_v20, %v298_v20  ;;  %299 = vst [vmem:[%s267_s26] sm:$0xff] %v298_v20 }
 0x1eb   : > { %627 = vmatmul.mubr.bf16.vlgmr.msra.gmra.mxu0 %v300_v21 }
 0x1ec   : > { %756 = shalt.err (!%p753_p7)
}
 0x1ed   : > { %s757_s21 = scalar_lea.hbm %s437_s9, 128  ;;  %s761_s26 = scalar_lea.hbm %s1079_s4, 256 }
 0x1ee   : > { %p758_p10 = scmp.ne.s32.totalorder %s437_s9, %s757_s21  ;;  %p762_p2 = scmp.lt.s32.totalorder %s437_s9, %s1079_s4 }
 0x1ef   : > { %p763_p12 = scmp.lt.s32.totalorder %s761_s26, %s757_s21 }
 0x1f0   : > { %p759_p4 = pnand %p758_p10, %p939_p9 }
 0x1f1   : > { %p764_p8 = por %p763_p12, %p762_p2 }
 0x1f2   : > { %p760_p13 = pneg %p759_p4 }
 0x1f4   : > { %p765_p0 = pnand %p764_p8, %p760_p13 }
 0x1f6   : > { %768 = shalt.err (!%p765_p0)
}
 0x1f7   : > { %633 = dma.vmem_to_hbm [thread:$0]  (%p939_p9), %s440_s5, 128, %s437_s9, %s412_s10  }
 0x1f8   : > { %s260_s11 = scalar_lea.vmem [#allocation5], %s582_s24  ;;  %s1029_s21 = scalar_lea.hbm %s1078_s3, %s596_s25 }
 0x1f9   : > { %s426_s12 = sshll.u32 %s260_s11, 4  ;;  %s407_s22 = scalar_lea.sflag [#allocation4], %s972_s6  ;;  %s1022_s12 = int_to_ptr.vmem [resolvable:$true] %s426_s12 }
 0x1fa   : > { %s769_s27 = scalar_lea.vmem %s1022_s12, 128  ;;  %s862_s24 = smov [#allocation5]  }
 0x1fb   : > { %p770_p1 = scmp.ne.s32.totalorder %s1022_s12, %s769_s27  ;;  %s773_s5 = sshll.u32 %s862_s24, 4  ;;  %s774_s5 = int_to_ptr.vmem [resolvable:$false] %s773_s5 }
 0x1fc   : > { %s775_s18 = scalar_lea.vmem %s774_s5, 256  ;;  %p776_p6 = scmp.lt.s32.totalorder %s1022_s12, %s774_s5 }
 0x1fd   : > { %p771_p3 = pnand %p770_p1, %p939_p9  ;;  %p777_p7 = scmp.lt.s32.totalorder %s775_s18, %s769_s27 }
 0x1ff   : > { %p772_p5 = pneg %p771_p3  ;;  %p778_p10 = por %p777_p7, %p776_p6 }
 0x201   : > { %p779_p4 = pnand %p778_p10, %p772_p5 }
 0x2ab   : > { %v399_v22 = vpop.f32.mrf.mxu0 }
 0x2ac   : > { %405 = vst [vmem:[%s260_s11] sm:$0xff] %v399_v22 }
 0x2ad   : > { %v628_v23 = vpop.f32.mrf.mxu0 }
 0x2ae   : > { %782 = shalt.err (!%p779_p4)
}
 0x2af   : > { %s783_s25 = scalar_lea.hbm %s1029_s21, 128  ;;  %s787_s10 = scalar_lea.hbm %s1078_s3, 256 }
 0x2b0   : > { %p784_p13 = scmp.ne.s32.totalorder %s1029_s21, %s783_s25  ;;  %p788_p8 = scmp.lt.s32.totalorder %s1029_s21, %s1078_s3 }
 0x2b1   : > { %p789_p0 = scmp.lt.s32.totalorder %s787_s10, %s783_s25 }
 0x2b2   : > { %p785_p2 = pnand %p784_p13, %p939_p9 }
 0x2b3   : > { %p790_p1 = por %p789_p0, %p788_p8 }
 0x2b4   : > { %p786_p12 = pneg %p785_p2 }
 0x2b6   : > { %p791_p3 = pnand %p790_p1, %p786_p12 }
 0x2b8   : > { %794 = shalt.err (!%p791_p3)
}
 0x2b9   : > { %632 = dma.vmem_to_hbm [thread:$0]  (%p939_p9), %s1022_s12, 128, %s1029_s21, %s407_s22   ;;  %v402_v24 = vpop.f32.mrf.mxu0 }
 0x2bb   : > { %v629_v25 = vpop.f32.mrf.mxu0 }
 0x2bc PF: > { %s451_s8 = sand.u32 1, %s833_s15   ;;  %p1085_p5 = scmp.ge.s32.totalorder %s853_s20, 2 }
 0x2bd   : > { %s452_s11 = scalar_lea.sflag [#allocation4], %s451_s8 }
 0x2be   : > { %p641_p6 = pnand %p1085_p5, %p946_p11 }
 0x2c0   : > { %p642_p7 = pneg %p641_p6 }
 0x2c2   : > { %824 = dma.done.wait (%p642_p7), %s452_s11, 128  }
 0x2c3   : > { %826 = vsyncadd (%p642_p7), %s452_s11, 4294967168  ;;  %s461_s13 = scalar_lea.sflag [#allocation7], %s451_s8 }
 0x2c4   : > { %828 = dma.done.wait (%p642_p7), %s461_s13, 128  }
 0x2c5   : > { %830 = vsyncadd (%p642_p7), %s461_s13, 4294967168  ;;  %s24_s20 = sadd.s32 1, %s853_s20   ;;  %s1086_s15 = smov %s837_s16 }
 0x2c6   : > { %p21_p9 = scmp.ge.s32.totalorder %s24_s20, 4   ;;  %s1087_s16 = smov %s841_s17 }
 0x2c7   : > { %s1088_s17 = smov %s944_s29  ;;  %s1089_s18 = smov %s849_s19 }
 0x2c8   : > { %s1090_s19 = smov %s1092_s23  ;;  %23 = sbr.rel (!%p21_p9) target bundleno = 8 (0x8), region = 100 }
 0x2cd   :  { %466 = vsyncpa [#allocation3], 1 }
 0x2ce   :  { %468 = vsyncpa [#allocation3 + $0x1], 1 }
 0x2cf   :  { %469 = vsyncpa [#allocation4], 1 }
 0x2d0   :  { %471 = vsyncpa [#allocation4 + $0x1], 1 }
 0x2d1   :  { %472 = vsyncpa [#allocation7], 1 }
 0x2d2   :  { %474 = vsyncpa [#allocation7 + $0x1], 1 }

</bundles_post_ra>
